<compile_context>
chip_gen: v7x
topology: tpu7x:2x2x1
jax: 0.10.0
libtpu: 0.0.40
codegen_flags: <defaults>
</compile_context>

<pallas_src>
import functools

import jax
import jax.numpy as jnp
from jax.experimental import pallas as pl
from jax.experimental.pallas import tpu as pltpu


# --------------------------------------------------------------------------- #
# Kernels
# --------------------------------------------------------------------------- #
def _pairwise_dot_single_kernel(x1_ref, x2_ref, o_ref):
    """Full feature axis in one block: no carry, no scratch, no epilogue."""
    a = x1_ref[...].astype(jnp.float32)
    b = x2_ref[...].astype(jnp.float32)
    o_ref[...] = jnp.sum(a * b, axis=1, keepdims=True).astype(o_ref.dtype)


def _pairwise_dot_reduce_body(x1_ref, x2_ref, o_ref, acc_ref, *,
                              feat_dim, feat_tile, mask_last):
    """Feature axis split across grid axis 1.

    acc_ref is None  -> accumulate directly into the (f32, VMEM-resident)
                        output block (its index_map ignores k).
    acc_ref is a ref -> f32 scratch accumulator, cast to o_ref.dtype on the
                        last feature step (narrow output dtypes).
    """
    k = pl.program_id(1)
    acc = o_ref if acc_ref is None else acc_ref

    @pl.when(k == 0)
    def _():
        acc[...] = jnp.zeros_like(acc)

    a = x1_ref[...].astype(jnp.float32)
    b = x2_ref[...].astype(jnp.float32)
    prod = a * b
    if mask_last:
        # Last feature block may be padded past the true D bound with garbage;
        # zero those lanes before the reduce (cheap VPU, hidden under DMA).
        col = jax.lax.broadcasted_iota(jnp.int32, prod.shape, dimension=1)
        valid = feat_dim - k * feat_tile
        prod = jnp.where(col < valid, prod, 0.0)

    acc[...] += jnp.sum(prod, axis=1, keepdims=True).astype(acc.dtype)

    if acc_ref is not None:
        @pl.when(k == pl.num_programs(1) - 1)
        def _():
            o_ref[...] = acc_ref[...].astype(o_ref.dtype)


# --------------------------------------------------------------------------- #
# Tiling heuristics
# --------------------------------------------------------------------------- #
def _round_up(x: int, m: int) -> int:
    return ((x + m - 1) // m) * m


def _sublane_multiple(dtype) -> int:
    """Sublane packing granularity: 8 for f32, 16 for bf16, 32 for int8/fp8."""
    return max(8, 32 // jnp.dtype(dtype).itemsize)


def _tpu_vmem_capacity_bytes() -> int:
    """Per-core VMEM capacity; conservative 64 MiB fallback if unqueryable."""
    try:
        info = pltpu.get_tpu_info()
        cap = getattr(info, "vmem_capacity_bytes", None)
        if cap:
            return int(cap)
    except Exception:
        pass
    return 64 * 1024 * 1024


def _pick_tiles(B: int, D: int, in_itemsize: int, out_itemsize: int,
                input_budget: int, sub: int):
    """Pick (TB, TD).  Footprint model: 2 inputs x 2 pipeline buffers of
    (TB, TD) plus 2 buffers of the lane-padded (TB, 128) output block."""
    d_lanes = max(_round_up(D, 128), 128)           # lane-padded feature width
    out_row_bytes = 2 * 128 * out_itemsize          # output block lane padding

    # Preferred: full feature axis per block -> 1-D grid, contiguous row DMAs.
    bytes_per_row_full = 4 * d_lanes * in_itemsize + out_row_bytes
    tb_full = (input_budget // bytes_per_row_full) // sub * sub
    if tb_full >= sub:
        tb = tb_full
        if B >= 2 * sub:
            # Keep >= 2 batch tiles so the "parallel" axis can split across
            # TensorCores (v7x megacore); negligible cost on 1-TC chips.
            tb = min(tb, _round_up(pl.cdiv(B, 2), sub))
        if tb >= B:
            tb = B
        return tb, D

    # Huge-D fallback: smallest legal batch tile, largest 128-multiple feature
    # tile that fits the budget; the partial last block is masked in-kernel.
    tb = sub if B > sub else B
    td = (input_budget - tb * out_row_bytes) // (4 * tb * in_itemsize)
    td = max(128, (td // 128) * 128)
    if td >= D:
        td = D
    return tb, td


# --------------------------------------------------------------------------- #
# Wrapper
# --------------------------------------------------------------------------- #
def pairwise_dot_product(x1: jax.Array, x2: jax.Array, *, tb=None, td=None) -> jax.Array:
    assert x1.shape == x2.shape, "Both tensors must have the same shapes"
    assert x1.dtype == x2.dtype, "Both tensors must have the same dtype"
    B, D = x1.shape
    in_itemsize = jnp.dtype(x1.dtype).itemsize
    out_dtype = x1.dtype                      # match the reference layer's dtype
    out_itemsize = jnp.dtype(out_dtype).itemsize

    # Generation-aware VMEM budgeting (explicit vmem_limit_bytes, not the
    # scoped default).  64-MiB parts (v7x-class) get the largest per-step
    # bytes that still leave headroom; 128-MiB parts (v5e/v6e) go bigger.
    vmem_cap = _tpu_vmem_capacity_bytes()
    if vmem_cap <= 64 * 1024 * 1024:
        input_budget = 40 * 1024 * 1024
        vmem_limit = 52 * 1024 * 1024
    else:
        input_budget = 56 * 1024 * 1024
        vmem_limit = 100 * 1024 * 1024

    sub = _sublane_multiple(x1.dtype)
    auto_tb, auto_td = _pick_tiles(B, D, in_itemsize, out_itemsize, input_budget, sub)
    TB = tb if tb is not None else auto_tb
    TD = td if td is not None else auto_td

    grid_b = pl.cdiv(B, TB)
    grid_k = pl.cdiv(D, TD)

    cost = pl.CostEstimate(
        flops=2 * B * D,
        bytes_accessed=2 * B * D * in_itemsize + B * out_itemsize,
        transcendentals=0,
    )
    out_shape = jax.ShapeDtypeStruct((B, 1), out_dtype)

    if grid_k == 1:
        # 1-D grid: full feature axis per block.
        grid_spec = pltpu.PrefetchScalarGridSpec(
            num_scalar_prefetch=0,
            grid=(grid_b,),
            in_specs=[
                pl.BlockSpec((TB, D), lambda i: (i, 0)),
                pl.BlockSpec((TB, D), lambda i: (i, 0)),
            ],
            out_specs=pl.BlockSpec((TB, 1), lambda i: (i, 0)),
            scratch_shapes=[],
        )
        kernel = _pairwise_dot_single_kernel
        dims = ("parallel",)
    else:
        mask_last = (D % TD) != 0
        body = functools.partial(
            _pairwise_dot_reduce_body,
            feat_dim=D, feat_tile=TD, mask_last=mask_last,
        )
        use_scratch = out_dtype != jnp.float32
        if use_scratch:
            kernel = lambda a, b, o, acc: body(a, b, o, acc)
            scratch = [pltpu.VMEM((TB, 1), jnp.float32)]
        else:
            kernel = lambda a, b, o: body(a, b, o, None)
            scratch = []
        grid_spec = pltpu.PrefetchScalarGridSpec(
            num_scalar_prefetch=0,
            grid=(grid_b, grid_k),
            in_specs=[
                pl.BlockSpec((TB, TD), lambda i, k: (i, k)),
                pl.BlockSpec((TB, TD), lambda i, k: (i, k)),
            ],
            out_specs=pl.BlockSpec((TB, 1), lambda i, k: (i, 0)),
            scratch_shapes=scratch,
        )
        dims = ("parallel", "arbitrary")

    return pl.pallas_call(
        kernel,
        out_shape=out_shape,
        grid_spec=grid_spec,
        compiler_params=pltpu.CompilerParams(
            dimension_semantics=dims,
            vmem_limit_bytes=vmem_limit,
        ),
        cost_estimate=cost,
    )(x1, x2)


# --------------------------------------------------------------------------- #
# Self-test
# --------------------------------------------------------------------------- #
if __name__ == "__main__":
    key = jax.random.PRNGKey(0)
    k1, k2, k3, k4 = jax.random.split(key, 4)

    def ref_fn(a, b):
        # Literal translation of the PyTorch forward (in f32 for a stable ref).
        prod = a.astype(jnp.float32) @ b.astype(jnp.float32).T
        eye = jnp.eye(prod.shape[0], dtype=jnp.float32)
        return jnp.sum(prod * eye, axis=1, keepdims=True)

    # 1) f32, auto tiling: 1-D grid, full feature axis, >= 2 batch tiles.
    B, D = 64, 256
    x1 = jax.random.normal(k1, (B, D), dtype=jnp.float32)
    x2 = jax.random.normal(k2, (B, D), dtype=jnp.float32)
    out = jax.block_until_ready(pairwise_dot_product(x1, x2))
    ref = ref_fn(x1, x2)
    assert out.shape == (B, 1), out.shape
    assert out.dtype == x1.dtype, out.dtype
    assert jnp.allclose(out, ref, atol=1e-4, rtol=1e-4)

    # 2) Forced multi-block feature reduction with a masked partial last block
    #    (D=320, td=128 -> 3 k-steps); f32 output accumulated in-place.
    B2, D2 = 48, 320
    y1 = jax.random.normal(k3, (B2, D2), dtype=jnp.float32)
    y2 = jax.random.normal(k4, (B2, D2), dtype=jnp.float32)
    out2 = jax.block_until_ready(pairwise_dot_product(y1, y2, tb=16, td=128))
    ref2 = ref_fn(y1, y2)
    assert out2.shape == (B2, 1), out2.shape
    assert jnp.allclose(out2, ref2, atol=1e-4, rtol=1e-4)

    # 3) bf16 in -> bf16 out with a split feature axis: exercises the f32
    #    scratch-accumulator path and the narrow-dtype output cast.
    z1 = y1.astype(jnp.bfloat16)
    z2 = y2.astype(jnp.bfloat16)
    out3 = jax.block_until_ready(pairwise_dot_product(z1, z2, tb=16, td=128))
    ref3 = ref_fn(z1, z2)
    assert out3.dtype == jnp.bfloat16, out3.dtype
    assert jnp.allclose(out3.astype(jnp.float32), ref3, atol=5e-2, rtol=5e-2)

    print("KERNEL_OK")
</pallas_src>

<mosaic_0001>
module attributes {stable_mosaic.version = 11 : i64} {
  func.func @_pairwise_dot_single_kernel(%arg0: i32, %arg1: memref<32x256xf32, #tpu.memory_space<vmem>>, %arg2: memref<32x256xf32, #tpu.memory_space<vmem>>, %arg3: memref<32x1xf32, #tpu.memory_space<vmem>>) attributes {dimension_semantics = [#tpu.dimension_semantics<parallel>], iteration_bounds = array<i64: 2>, scalar_prefetch = 0 : i64, scratch_operands = 0 : i64, tpu.core_type = #tpu.core_type<tc>, window_params = [{transform_indices = @transform_0, window_bounds = array<i64: 32, 256>}, {transform_indices = @transform_1, window_bounds = array<i64: 32, 256>}, {transform_indices = @transform_2, window_bounds = array<i64: 32, 1>}]} {
    %c0 = arith.constant 0 : index
    %c0_0 = arith.constant 0 : index
    %0 = vector.load %arg1[%c0, %c0_0] : memref<32x256xf32, #tpu.memory_space<vmem>>, vector<32x256xf32>
    %c0_1 = arith.constant 0 : index
    %c0_2 = arith.constant 0 : index
    %1 = vector.load %arg2[%c0_1, %c0_2] : memref<32x256xf32, #tpu.memory_space<vmem>>, vector<32x256xf32>
    %2 = arith.mulf %0, %1 : vector<32x256xf32>
    %cst = arith.constant dense<0.000000e+00> : vector<32xf32>
    %3 = vector.multi_reduction <add>, %2, %cst [1] : vector<32x256xf32> to vector<32xf32>
    %4 = vector.shape_cast %3 : vector<32xf32> to vector<32x1xf32>
    %c0_3 = arith.constant 0 : index
    %c0_4 = arith.constant 0 : index
    %5 = vector.load %arg3[%c0_3, %c0_4] : memref<32x1xf32, #tpu.memory_space<vmem>>, vector<32x1xf32>
    tpu.vector_store %arg3[%c0_3, %c0_4], %4 {strides = array<i32>} : memref<32x1xf32, #tpu.memory_space<vmem>>, vector<32x1xf32>,
    return
  }
  func.func @transform_0(%arg0: i32) -> (i32, i32) {
    %c0_i32 = arith.constant 0 : i32
    %c0_i32_0 = arith.constant 0 : i32
    return %arg0, %c0_i32 : i32, i32
  }
  func.func @transform_1(%arg0: i32) -> (i32, i32) {
    %c0_i32 = arith.constant 0 : i32
    %c0_i32_0 = arith.constant 0 : i32
    return %arg0, %c0_i32 : i32, i32
  }
  func.func @transform_2(%arg0: i32) -> (i32, i32) {
    %c0_i32 = arith.constant 0 : i32
    %c0_i32_0 = arith.constant 0 : i32
    return %arg0, %c0_i32 : i32, i32
  }
}

</mosaic_0001>

<bundles_post_ra>
// kernel: tpu_custom_call.1
= control target key start
LH: loop header
LB: loop body
LE: loop exit
PB: predicated region body
PF: predicated region fallthrough
CT: control target
= control target key end

     0   :  { %7 = vsyncpa [#allocation3], 0  ;;  %s695_s0 = inlined_call_operand.hbm [shape: f32[64,256], index: 0, kind: input, shape index: {}]   ;;  %s696_s1 = inlined_call_operand.hbm [shape: f32[64,256], index: 1, kind: input, shape index: {}]   ;;  %s697_s2 = inlined_call_operand.vmem [shape: f32[64,1], index: 2, kind: output, shape index: {}]  }
   0x1   :  { %9 = vsyncpa [#allocation3 + $0x1], 0 }
   0x2   :  { %10 = vsyncpa [#allocation5], 0 }
   0x3   :  { %12 = vsyncpa [#allocation5 + $0x1], 0  ;;  %s528_s9 = smov 0   ;;  %s530_s10 = smov 0  }
   0x4   :  { %s532_s11 = smov 0   ;;  %s534_s12 = smov 0  }
   0x5 LB: > { %s340_s13 = sadd.s32 4294967295, %s507_s12   ;;  %s548_s14 = sadd.s32 1, %s507_s12   ;;  %s507_s12 = sphi %s534_s12, %s707_s12   ;;  %s503_s11 = sphi %s532_s11, %s706_s11   ;;  %s499_s10 = sphi %s530_s10, %s705_s10   ;;  %s495_s9 = sphi %s528_s9, %s704_s9  }
   0x6   : > { %s22_s15 = ssub.s32 %s507_s12, %s548_s14  ;;  %s25_s16 = sadd.s32 1, %s503_s11 }
   0x7   : > { %p23_p0 = scmp.eq.s32.totalorder %s22_s15, 0  ;;  %p32_p1 = scmp.ne.s32.totalorder %s503_s11, %s499_s10 }
   0x8   : > { %p33_p2 = scmp.eq.s32.totalorder %s507_s12, 0  ;;  %p38_p3 = scmp.ne.s32.totalorder %s499_s10, %s495_s9 }
   0x9   : > { %s558_s17 = scalar_select %p23_p0, %s503_s11, %s25_s16  }
   0xa   : > { %p34_p4 = por %p33_p2, %p32_p1  ;;  %p39_p5 = scmp.eq.s32.totalorder %s340_s13, 0 }
   0xb   : > { %p374_p6 = scmp.lt.s32.totalorder %s507_s12, 2  ;;  %s568_s19 = sand.u32 1, %s503_s11  }
   0xc   : > { %p563_p7 = por %p39_p5, %p38_p3  ;;  %s344_s20 = sshll.u32 %s568_s19, 6 }
   0xd   : > { %s360_s21 = sshll.u32 %s507_s12, 10  ;;  %s118_s25 = scalar_lea.vmem [#allocation2], %s344_s20 }
   0xe   : > { %s699_s18 = scalar_select %p563_p7, 1, 0 }
   0xf   : > { %s577_s24 = scalar_lea.hbm %s695_s0, %s360_s21  ;;  %s126_s26 = sshll.u32 %s118_s25, 4  ;;  %s581_s26 = int_to_ptr.vmem [resolvable:$true] %s126_s26 }
  0x10   : > { %p583_p8 = pnand %p374_p6, %p34_p4  ;;  %s115_s28 = scalar_lea.sflag [#allocation3], %s568_s19 }
  0x11   : > { %s409_s29 = scalar_lea.hbm %s577_s24, 1024  ;;  %s414_s4 = scalar_lea.hbm %s695_s0, 2048 }
  0x12   : > { %p410_p10 = scmp.ne.s32.totalorder %s577_s24, %s409_s29  ;;  %p411_p11 = pneg %p583_p8 }
  0x13   : > { %p415_p0 = scmp.lt.u32.totalorder %s577_s24, %s695_s0  ;;  %p416_p1 = scmp.lt.u32.totalorder %s414_s4, %s409_s29 }
  0x14   : > { %p412_p12 = pnand %p411_p11, %p410_p10  ;;  %p418_p3 = scmp.lt.u32.totalorder %s409_s29, %s577_s24 }
  0x15   : > { %p417_p2 = por %p416_p1, %p415_p0 }
  0x16   : > { %p413_p13 = pneg %p412_p12 }
  0x17   : > { %p419_p4 = por %p418_p3, %p417_p2 }
  0x19   : > { %p420_p5 = pnand %p419_p4, %p413_p13 }
  0x1b   : > { %423 = shalt.err (!%p420_p5)
}
  0x1c   : > { %s424_s7 = scalar_lea.vmem %s581_s26, 1024  ;;  %s509_s8 = smov [#allocation2]  }
  0x1d   : > { %p425_p6 = scmp.ne.s32.totalorder %s581_s26, %s424_s7  ;;  %s429_s9 = sshll.u32 %s509_s8, 4  ;;  %s430_s9 = int_to_ptr.vmem [resolvable:$false] %s429_s9 }
  0x1e   : > { %s431_s15 = scalar_lea.vmem %s430_s9, 2048  ;;  %p432_p9 = scmp.lt.s32.totalorder %s581_s26, %s430_s9 }
  0x1f   : > { %p427_p10 = pnand %p425_p6, %p411_p11  ;;  %p433_p0 = scmp.lt.s32.totalorder %s431_s15, %s424_s7 }
  0x21   : > { %p428_p12 = pneg %p427_p10  ;;  %p434_p1 = por %p433_p0, %p432_p9 }
  0x23   : > { %p435_p2 = pnand %p434_p1, %p428_p12 }
  0x25   : > { %438 = shalt.err (!%p435_p2)
}
  0x26   : > { %s510_s16 = smov 256   ;;  %s511_s22 = smov 16  }
  0x27   : > { %370 = dma.hbm_to_vmem [thread:$0]  (!%p583_p8), %s577_s24, 1024, %s581_s26, %s115_s28, %s510_s16, %s510_s16, %s511_s22  }
  0x28   : > { %p156_p9 = scmp.lt.s32.totalorder %s507_s12, 3  ;;  %s625_s29 = scalar_lea.hbm %s696_s1, %s360_s21 }
  0x29   : > { %p701_p13 = scmp.ge.s32.totalorder %s507_s12, 1  ;;  %s140_s3 = scalar_lea.vmem [#allocation4], %s344_s20 }
  0x2a   : > { %s148_s4 = sshll.u32 %s140_s3, 4  ;;  %s137_s24 = scalar_lea.sflag [#allocation5], %s568_s19  ;;  %s635_s4 = int_to_ptr.vmem [resolvable:$true] %s148_s4 }
  0x2b   : > { %p629_p3 = pnand %p701_p13, %p156_p9  ;;  %s439_s26 = scalar_lea.hbm %s625_s29, 1024 }
  0x2c   : > { %p440_p4 = scmp.ne.s32.totalorder %s625_s29, %s439_s26  ;;  %s444_s5 = scalar_lea.hbm %s696_s1, 2048 }
  0x2d   : > { %p445_p10 = scmp.lt.u32.totalorder %s625_s29, %s696_s1  ;;  %p446_p12 = scmp.lt.u32.totalorder %s444_s5, %s439_s26 }
  0x2e   : > { %p442_p5 = pnand %p440_p4, %p411_p11  ;;  %p448_p1 = scmp.lt.u32.totalorder %s439_s26, %s625_s29 }
  0x2f   : > { %p447_p0 = por %p446_p12, %p445_p10 }
  0x30   : > { %p443_p6 = pneg %p442_p5 }
  0x31   : > { %p449_p2 = por %p448_p1, %p447_p0 }
  0x33   : > { %p450_p9 = pnand %p449_p2, %p443_p6 }
  0x35   : > { %453 = shalt.err (!%p450_p9)
}
  0x36   : > { %s454_s20 = scalar_lea.vmem %s635_s4, 1024  ;;  %s512_s8 = smov [#allocation4]  }
  0x37   : > { %p455_p13 = scmp.ne.s32.totalorder %s635_s4, %s454_s20  ;;  %s459_s9 = sshll.u32 %s512_s8, 4  ;;  %s460_s9 = int_to_ptr.vmem [resolvable:$false] %s459_s9 }
  0x38   : > { %s461_s15 = scalar_lea.vmem %s460_s9, 2048  ;;  %p462_p7 = scmp.lt.s32.totalorder %s635_s4, %s460_s9 }
  0x39   : > { %p457_p4 = pnand %p455_p13, %p411_p11  ;;  %p463_p10 = scmp.lt.s32.totalorder %s461_s15, %s454_s20 }
  0x3b   : > { %p458_p5 = pneg %p457_p4  ;;  %p464_p12 = por %p463_p10, %p462_p7 }
  0x3d   : > { %p465_p0 = pnand %p464_p12, %p458_p5 }
  0x3f   : > { %468 = shalt.err (!%p465_p0)
}
  0x40   : > { %373 = dma.hbm_to_vmem [thread:$0]  (!%p583_p8), %s625_s29, 1024, %s635_s4, %s137_s24, %s510_s16, %s510_s16, %s511_s22  }
  0x41   : > { %160 = sbr.rel (%p629_p3) target bundleno = 230 (0xe6), region = 28  ;;  %s162_s23 = sand.u32 (!%p629_p3), 1, %s499_s10  }
  0x42   : > { %s353_s25 = sshll.u32 (!%p629_p3), %s162_s23, 6  ;;  %s163_s3 = scalar_lea.sflag (!%p629_p3), [#allocation3], %s162_s23 }
  0x43   : > { %s166_s26 = scalar_lea.vmem (!%p629_p3), [#allocation2], %s353_s25  ;;  %p703_p7 = scmp.ne.s32.totalorder (!%p629_p3), %s699_s18, 0 }
  0x48   : > { %486 = dma.done.wait (%p703_p7), %s163_s3, 1024  }
  0x49   : > { %488 = vsyncadd (%p703_p7), %s163_s3, 4294966272  ;;  %s172_s27 = scalar_lea.sflag [#allocation5], %s162_s23  ;;  %s175_s19 = scalar_lea.vmem [#allocation4], %s353_s25 }
  0x4a   : > { %490 = dma.done.wait (%p703_p7), %s172_s27, 1024  }
  0x4b   : > { %492 = vsyncadd (%p703_p7), %s172_s27, 4294966272  ;;  %v209_v0 = vld [vmem:[%s166_s26] sm:$0xff]  ;;  %v210_v1 = vld [vmem:[%s166_s26 + $0x8] sm:$0xff]  ;;  %s355_s18 = sshll.u32 %s340_s13, 2  ;;  %vm245_vm0 = vcmask 7168  }
  0x4c   : > { %v217_v2 = vld [vmem:[%s175_s19] sm:$0xff]  ;;  %v218_v3 = vld [vmem:[%s175_s19 + $0x8] sm:$0xff]  ;;  %v211_v10 = vld [vmem:[%s166_s26 + $0x10] sm:$0xff]  ;;  %p204_p8 = scmp.lt.s32.totalorder %s355_s18, 7 }
  0x4d   : > { %v225_v4 = vmul.f32 %v217_v2, %v209_v0  ;;  %v213_v5 = vld [vmem:[%s166_s26 + $0x20] sm:$0xff]  ;;  %v214_v6 = vld [vmem:[%s166_s26 + $0x28] sm:$0xff]  ;;  %v226_v7 = vmul.f32 %v218_v3, %v210_v1  ;;  %v212_v13 = vld [vmem:[%s166_s26 + $0x18] sm:$0xff] }
  0x4e   : > { %v221_v8 = vld [vmem:[%s175_s19 + $0x20] sm:$0xff]  ;;  %v222_v9 = vld [vmem:[%s175_s19 + $0x28] sm:$0xff]  ;;  %v219_v14 = vld [vmem:[%s175_s19 + $0x10] sm:$0xff]  ;;  %s709_s18 = smov (!%p204_p8, %s355_s18), 7 }
  0x4f   : > { %v229_v11 = vmul.f32 %v221_v8, %v213_v5  ;;  %v230_v12 = vmul.f32 %v222_v9, %v214_v6  ;;  %v220_v15 = vld [vmem:[%s175_s19 + $0x18] sm:$0xff]  ;;  %v233_v16 = vadd.f32 %v226_v7, %v225_v4  ;;  %v227_v17 = vmul.f32 %v219_v14, %v211_v10  ;;  %v215_v19 = vld [vmem:[%s166_s26 + $0x30] sm:$0xff]  ;;  %s356_s16 = sshll.u32 %s709_s18, 3 }
  0x50   : > { %v228_v18 = vmul.f32 %v220_v15, %v212_v13  ;;  %v216_v20 = vld [vmem:[%s166_s26 + $0x38] sm:$0xff]  ;;  %v223_v21 = vld [vmem:[%s175_s19 + $0x30] sm:$0xff]  ;;  %s207_s30 = scalar_lea.vmem %s697_s2, %s356_s16 }
  0x51   : > { %v239_v22 = vadd.f32 %v230_v12, %v229_v11  ;;  %v224_v23 = vld [vmem:[%s175_s19 + $0x38] sm:$0xff]  ;;  %v231_v24 = vmul.f32 %v223_v21, %v215_v19  ;;  %234 = vadd.xlane.f32.xlu0 %v233_v16 }
  0x52   : > { %v236_v25 = vadd.f32 %v228_v18, %v227_v17  ;;  %v232_v26 = vmul.f32 %v224_v23, %v216_v20 }
  0x53   : > { %240 = vadd.xlane.f32.xlu1 %v239_v22 }
  0x54   : > { %v242_v27 = vadd.f32 %v232_v26, %v231_v24 }
  0x55   : > { %237 = vadd.xlane.f32.xlu0 %v236_v25 }
  0x57   : > { %243 = vadd.xlane.f32.xlu1 %v242_v27 }
  0xde   : > { %v235_v28 = vpop.xlane.xlu0 %234 }
  0xdf   : > { %246 = vst.msk [vmem:[%s207_s30] sm:$0xff] %vm245_vm0, %v235_v28 }
  0xe0   : > { %v241_v29 = vpop.xlane.xlu1 %240 }
  0xe1   : > { %248 = vst.msk [vmem:[%s207_s30 + $0x10] sm:$0xff] %vm245_vm0, %v241_v29 }
  0xe2   : > { %v238_v30 = vpop.xlane.xlu0 %237 }
  0xe3   : > { %247 = vst.msk [vmem:[%s207_s30 + $0x8] sm:$0xff] %vm245_vm0, %v238_v30 }
  0xe4   : > { %v244_v31 = vpop.xlane.xlu1 %243 }
  0xe5   : > { %249 = vst.msk [vmem:[%s207_s30 + $0x18] sm:$0xff] %vm245_vm0, %v244_v31 }
  0xe6 PF: > { %p15_p11 = scmp.ge.s32.totalorder %s548_s14, 4   ;;  %s704_s9 = smov %s499_s10 }
  0xe7   : > { %s705_s10 = smov %s503_s11  ;;  %s706_s11 = smov %s558_s17 }
  0xe8   : > { %s707_s12 = smov %s548_s14  ;;  %17 = sbr.rel (!%p15_p11) target bundleno = 5 (0x5), region = 81 }
  0xef   :  { %272 = vsyncpa [#allocation3], 1 }
  0xf0   :  { %274 = vsyncpa [#allocation3 + $0x1], 1 }
  0xf1   :  { %275 = vsyncpa [#allocation5], 1 }
  0xf2   :  { %277 = vsyncpa [#allocation5 + $0x1], 1 }

</bundles_post_ra>
